<compile_context>
chip_gen: v6e
topology: v6e:2x2x1
jax: 0.10.0
libtpu: 0.0.40
codegen_flags: <defaults>
</compile_context>

<pallas_src>
import functools

import jax
import jax.numpy as jnp
from jax.experimental import pallas as pl
from jax.experimental.pallas import tpu as pltpu


def _round_up(x, m):
    return (x + m - 1) // m * m


# ----------------------------- Pallas kernel -------------------------------
def _conv_bn_relu_kernel(xcol_ref, w_ref, bias_ref, o_ref):
    # xcol_ref: (Kp, TP)        bf16 im2col patches for this lane tile
    # w_ref   : (Cout_pad, Kp)  bf16 conv weight with BN scale folded in
    # bias_ref: (Cout_pad, 1)   f32 folded BN bias
    # o_ref   : (Cout_pad, TP)  f32 output tile
    acc = jnp.dot(w_ref[...], xcol_ref[...],
                  preferred_element_type=jnp.float32)          # MXU: bf16 in, f32 acc
    y = acc + bias_ref[...]                                    # per-channel BN bias
    o_ref[...] = jnp.maximum(y, 0.0).astype(o_ref.dtype)       # ReLU


# ------------------------------- glue (JAX) --------------------------------
def _im2col_batch_folded(x_nchw, kh, kw, stride, padding):
    """(N, Cin, H, W) -> (Cin*KH*KW, N*Hout*Wout).

    Rows ordered (cin, kh, kw) to match weight.reshape(Cout, Cin*KH*KW);
    columns ordered (n, hout, wout) so batch is folded into the lane axis.
    """
    n, cin, h, w = x_nchw.shape
    hout = (h + 2 * padding - kh) // stride + 1
    wout = (w + 2 * padding - kw) // stride + 1
    xp = jnp.pad(x_nchw, ((0, 0), (0, 0), (padding, padding), (padding, padding)))
    taps = []
    for i in range(kh):
        for j in range(kw):
            taps.append(
                xp[:, :,
                   i: i + (hout - 1) * stride + 1: stride,
                   j: j + (wout - 1) * stride + 1: stride])    # (N, Cin, Hout, Wout)
    col = jnp.stack(taps, axis=2)                              # (N, Cin, KH*KW, Ho, Wo)
    col = col.transpose(1, 2, 0, 3, 4)                         # (Cin, KH*KW, N, Ho, Wo)
    return col.reshape(cin * kh * kw, n * hout * wout), hout, wout


@functools.partial(jax.jit, static_argnames=("stride", "padding", "lane_tile"))
def basic_conv2d(x, weight, gamma, beta, running_mean, running_var,
                 *, stride, padding, eps=1e-3, lane_tile=512):
    """Pallas-backed BasicConv2d forward. x: NCHW f32, weight: (Cout, Cin, KH, KW)."""
    n = x.shape[0]
    cout, cin, kh, kw = weight.shape

    # im2col in bf16 (halves patch-matrix HBM traffic).
    # TODO(synk): for large Inception layers, accumulate the KH*KW taps inside
    # the kernel (grid axis over taps + element-offset index_maps + f32 VMEM
    # accumulator) to remove the KH*KW read inflation of materialized im2col.
    xcol, hout, wout = _im2col_batch_folded(
        x.astype(jnp.bfloat16), kh, kw, stride, padding)       # (K, N*P) bf16
    k = cin * kh * kw
    np_tot = n * hout * wout

    # Padded, tile-aligned shapes (lane-dense output, sublane-aligned rows).
    cout_pad = _round_up(cout, 8)
    kp = _round_up(k, 8)
    lane_tile = _round_up(lane_tile, 128)
    tp = min(lane_tile, _round_up(np_tot, 128))
    np_pad = _round_up(np_tot, tp)

    xcol = jnp.pad(xcol, ((0, kp - k), (0, np_pad - np_tot)))

    # Fold BN (inference) into the weights: y = (w * scale) @ x + bias.
    scale = (gamma / jnp.sqrt(running_var + eps)).astype(jnp.float32)
    bias = (beta - running_mean * scale).astype(jnp.float32)
    w_mat = weight.reshape(cout, k).astype(jnp.float32) * scale[:, None]
    w_mat = jnp.pad(w_mat, ((0, cout_pad - cout), (0, kp - k))).astype(jnp.bfloat16)
    bias_col = jnp.pad(bias, (0, cout_pad - cout)).reshape(cout_pad, 1)

    grid = (np_pad // tp,)

    # VMEM budget: double-buffered xcol/out tiles + resident weight/bias.
    tile_bytes = (kp * tp * 2) + (cout_pad * kp * 2) + (cout_pad * 4) + (cout_pad * tp * 4)
    vmem_limit = int(min(32 * 1024 * 1024, max(4 * 1024 * 1024, 4 * tile_bytes)))

    cost = pl.CostEstimate(
        flops=2 * cout * k * np_tot,
        transcendentals=0,
        bytes_accessed=xcol.size * 2 + w_mat.size * 2 + cout_pad * np_pad * 4,
    )

    out = pl.pallas_call(
        _conv_bn_relu_kernel,
        out_shape=jax.ShapeDtypeStruct((cout_pad, np_pad), jnp.float32),
        grid=grid,
        in_specs=[
            pl.BlockSpec((kp, tp), lambda i: (0, i)),          # xcol lane tile
            pl.BlockSpec((cout_pad, kp), lambda i: (0, 0)),    # weight (resident)
            pl.BlockSpec((cout_pad, 1), lambda i: (0, 0)),     # bias   (resident)
        ],
        out_specs=pl.BlockSpec((cout_pad, tp), lambda i: (0, i)),
        compiler_params=pltpu.CompilerParams(
            dimension_semantics=("parallel",),
            vmem_limit_bytes=vmem_limit),
        cost_estimate=cost,
    )(xcol, w_mat, bias_col)

    out = out[:cout, :np_tot].reshape(cout, n, hout, wout)     # drop padding
    return out.transpose(1, 0, 2, 3)                           # NCHW, like PyTorch


# --------------------------- reference (pure JAX) ---------------------------
def basic_conv2d_ref(x, weight, gamma, beta, running_mean, running_var,
                     *, stride, padding, eps=1e-3):
    y = jax.lax.conv_general_dilated(
        x, weight, window_strides=(stride, stride),
        padding=[(padding, padding), (padding, padding)],
        dimension_numbers=("NCHW", "OIHW", "NCHW"),
        precision=jax.lax.Precision.HIGHEST)
    scale = gamma / jnp.sqrt(running_var + eps)
    bias = beta - running_mean * scale
    y = y * scale[None, :, None, None] + bias[None, :, None, None]
    return jnp.maximum(y, 0.0)


if __name__ == "__main__":
    # BasicConv2d(in_planes=4, out_planes=8, kernel_size=3, stride=1, padding=1)
    in_planes, out_planes, ksize, stride, padding = 4, 8, 3, 1, 1
    N, H, W = 2, 16, 16

    key = jax.random.PRNGKey(0)
    kx, kw_, kg, kb, km, kv = jax.random.split(key, 6)

    x = jax.random.normal(kx, (N, in_planes, H, W), dtype=jnp.float32)
    weight = 0.1 * jax.random.normal(kw_, (out_planes, in_planes, ksize, ksize),
                                     dtype=jnp.float32)
    gamma = 1.0 + 0.1 * jax.random.normal(kg, (out_planes,), dtype=jnp.float32)
    beta = 0.1 * jax.random.normal(kb, (out_planes,), dtype=jnp.float32)
    running_mean = 0.1 * jax.random.normal(km, (out_planes,), dtype=jnp.float32)
    running_var = jax.random.uniform(kv, (out_planes,), dtype=jnp.float32,
                                     minval=0.5, maxval=1.5)

    # lane_tile=256 -> N*P=512 is split into 2 parallel grid steps (exercises
    # the lane-tile index_map); real layers use the default 512-wide tiles.
    out = basic_conv2d(x, weight, gamma, beta, running_mean, running_var,
                       stride=stride, padding=padding, lane_tile=256)
    out = jax.block_until_ready(out)

    ref = basic_conv2d_ref(x, weight, gamma, beta, running_mean, running_var,
                           stride=stride, padding=padding)
    assert out.shape == (N, out_planes, H, W), out.shape
    # bf16 MXU operands with f32 accumulation: expect ~1e-3 abs error here.
    max_err = float(jnp.max(jnp.abs(out - ref)))
    assert max_err < 2e-2, f"mismatch vs reference: max abs err = {max_err}"

    print("KERNEL_OK")
</pallas_src>

<mosaic_0001>
module attributes {stable_mosaic.version = 11 : i64} {
  func.func @_conv_bn_relu_kernel(%arg0: i32, %arg1: memref<40x256xbf16, #tpu.memory_space<vmem>>, %arg2: memref<8x40xbf16, #tpu.memory_space<vmem>>, %arg3: memref<8x1xf32, #tpu.memory_space<vmem>>, %arg4: memref<8x256xf32, #tpu.memory_space<vmem>>) attributes {dimension_semantics = [#tpu.dimension_semantics<parallel>], iteration_bounds = array<i64: 2>, scalar_prefetch = 0 : i64, scratch_operands = 0 : i64, tpu.core_type = #tpu.core_type<tc>, window_params = [{transform_indices = @transform_0, window_bounds = array<i64: 40, 256>}, {pipeline_mode = #tpu.pipeline_mode<synchronous>, transform_indices = @transform_1, window_bounds = array<i64: 8, 40>}, {pipeline_mode = #tpu.pipeline_mode<synchronous>, transform_indices = @transform_2, window_bounds = array<i64: 8, 1>}, {transform_indices = @transform_3, window_bounds = array<i64: 8, 256>}]} {
    %c0 = arith.constant 0 : index
    %c0_0 = arith.constant 0 : index
    %0 = vector.load %arg2[%c0, %c0_0] : memref<8x40xbf16, #tpu.memory_space<vmem>>, vector<8x40xbf16>
    %c0_1 = arith.constant 0 : index
    %c0_2 = arith.constant 0 : index
    %1 = vector.load %arg1[%c0_1, %c0_2] : memref<40x256xbf16, #tpu.memory_space<vmem>>, vector<40x256xbf16>
    %cst = arith.constant dense<0.000000e+00> : vector<8x256xf32>
    %2 = tpu.matmul %0, %1, %cst {dimension_numbers = #tpu.dot_dimension_numbers<[1], [0], [0], [1], [0, 0, 1, 1], [], []>} : vector<8x40xbf16>, vector<40x256xbf16>, vector<8x256xf32> -> vector<8x256xf32>
    %c0_3 = arith.constant 0 : index
    %c0_4 = arith.constant 0 : index
    %3 = vector.load %arg3[%c0_3, %c0_4] : memref<8x1xf32, #tpu.memory_space<vmem>>, vector<8x1xf32>
    %4 = vector.broadcast %3 : vector<8x1xf32> to vector<8x256xf32>
    %5 = arith.addf %2, %4 : vector<8x256xf32>
    %cst_5 = arith.constant 0.000000e+00 : f32
    %6 = vector.broadcast %cst_5 : f32 to vector<8x256xf32>
    %7 = arith.maximumf %5, %6 : vector<8x256xf32>
    %c0_6 = arith.constant 0 : index
    %c0_7 = arith.constant 0 : index
    %8 = vector.load %arg4[%c0_6, %c0_7] : memref<8x256xf32, #tpu.memory_space<vmem>>, vector<8x256xf32>
    tpu.vector_store %arg4[%c0_6, %c0_7], %7 {strides = array<i32>} : memref<8x256xf32, #tpu.memory_space<vmem>>, vector<8x256xf32>,
    return
  }
  func.func @transform_0(%arg0: i32) -> (i32, i32) {
    %c0_i32 = arith.constant 0 : i32
    %c0_i32_0 = arith.constant 0 : i32
    return %c0_i32, %arg0 : i32, i32
  }
  func.func @transform_1(%arg0: i32) -> (i32, i32) {
    %c0_i32 = arith.constant 0 : i32
    %c0_i32_0 = arith.constant 0 : i32
    %c0_i32_1 = arith.constant 0 : i32
    return %c0_i32, %c0_i32_0 : i32, i32
  }
  func.func @transform_2(%arg0: i32) -> (i32, i32) {
    %c0_i32 = arith.constant 0 : i32
    %c0_i32_0 = arith.constant 0 : i32
    %c0_i32_1 = arith.constant 0 : i32
    return %c0_i32, %c0_i32_0 : i32, i32
  }
  func.func @transform_3(%arg0: i32) -> (i32, i32) {
    %c0_i32 = arith.constant 0 : i32
    %c0_i32_0 = arith.constant 0 : i32
    return %c0_i32, %arg0 : i32, i32
  }
}

</mosaic_0001>

<bundles_post_ra>
// kernel: basic_conv2d.1
= control target key start
LH: loop header
LB: loop body
LE: loop exit
PB: predicated region body
PF: predicated region fallthrough
CT: control target
= control target key end

     0   :  { %s482_s12 = smov 0   ;;  %s484_s13 = smov 0   ;;  %s540_s0 = inlined_call_operand.vmem [shape: bf16[40,512], index: 0, kind: input, shape index: {}]   ;;  %s541_s1 = inlined_call_operand.vmem [shape: bf16[8,40], index: 1, kind: input, shape index: {}]   ;;  %s542_s2 = inlined_call_operand.vmem [shape: f32[8,1], index: 2, kind: input, shape index: {}]   ;;  %s543_s3 = inlined_call_operand.vmem [shape: f32[8,512], index: 3, kind: output, shape index: {}]  }
   0x1   :  { %s486_s14 = smov 0  }
   0x2 LB: > { %s381_s15 = sadd.s32 4294967295, %s459_s14   ;;  %s499_s16 = sadd.s32 1, %s459_s14   ;;  %s459_s14 = sphi %s486_s14, %s546_s14   ;;  %s455_s13 = sphi %s484_s13, %s545_s13   ;;  %s451_s12 = sphi %s482_s12, %s544_s12  }
   0x3   : > { %s17_s17 = ssub.s32 %s459_s14, %s499_s16  ;;  %s20_s18 = sadd.s32 1, %s455_s13 }
   0x4   : > { %p18_p0 = scmp.eq.s32.totalorder %s17_s17, 0  ;;  %p27_p1 = scmp.ne.s32.totalorder %s455_s13, %s451_s12 }
   0x5   : > { %p28_p2 = scmp.eq.s32.totalorder %s459_s14, 0  ;;  %p384_p4 = scmp.ge.s32.totalorder %s459_s14, 2 }
   0x6   : > { %s508_s19 = scalar_select %p18_p0, %s455_s13, %s20_s18  }
   0x7   : > { %p29_p3 = por %p28_p2, %p27_p1  ;;  %127 = sbr.rel (%p384_p4) target bundleno = 19 (0x13), region = 24 }
   0xc   : > { %130 = sbr.rel (!%p29_p3) target bundleno = 19 (0x13), region = 28  ;;  %s132_s20 = sand.u32 (%p29_p3), 1, %s455_s13  }
   0xd   : > { %s400_s21 = sshll.u32 (%p29_p3), %s459_s14, 3  ;;  %s401_s22 = smul.u32 (%p29_p3), 40, %s132_s20 }
   0xe   : > { %s137_s25 = scalar_lea.vmem (%p29_p3), %s540_s0, %s400_s21 }
   0xf   : > { %v174_v0 = vld [vmem:[%s137_s25] sm:$0xff] (%p29_p3)  ;;  %v176_v1 = vld [vmem:[%s137_s25 + $0x10] sm:$0xff] (%p29_p3)  ;;  %s134_s26 = scalar_lea.vmem (%p29_p3), [#allocation2], %s401_s22 }
  0x10   : > { %v178_v2 = vld [vmem:[%s137_s25 + $0x20] sm:$0xff] (%p29_p3)  ;;  %v180_v3 = vld [vmem:[%s137_s25 + $0x30] sm:$0xff] (%p29_p3)  ;;  %175 = vst [vmem:[%s134_s26] sm:$0xff] (%p29_p3), %v174_v0  ;;  %177 = vst [vmem:[%s134_s26 + $0x8] sm:$0xff] (%p29_p3), %v176_v1 }
  0x11   : > { %v182_v4 = vld [vmem:[%s137_s25 + $0x40] sm:$0xff]  ;;  %179 = vst [vmem:[%s134_s26 + $0x10] sm:$0xff] %v178_v2  ;;  %181 = vst [vmem:[%s134_s26 + $0x18] sm:$0xff] %v180_v3 }
  0x12   : > { %183 = vst [vmem:[%s134_s26 + $0x20] sm:$0xff] %v182_v4 }
  0x13 PF: > { %p387_p5 = scmp.ge.s32.totalorder %s459_s14, 1  ;;  %p188_p6 = scmp.lt.s32.totalorder %s459_s14, 3 }
  0x15   : > { %p189_p7 = pnand %p387_p5, %p188_p6 }
  0x16   : > { %s195_s27 = sand.u32 (!%p189_p7), 1, %s451_s12   ;;  %s388_s7 = sshll.u32 (!%p189_p7), %s381_s15, 1 }
  0x17   : > { %192 = sbr.rel (%p189_p7) target bundleno = 244 (0xf4), region = 66  ;;  %p220_p8 = scmp.lt.s32.totalorder (!%p189_p7), %s388_s7, 3 }
  0x18   : > { %s402_s28 = smul.u32 (!%p189_p7), 40, %s195_s27 }
  0x1a   : > { %s197_s4 = scalar_lea.vmem (!%p189_p7), [#allocation2], %s402_s28 }
  0x1c   : > { %v461_v5 = vmov 0   ;;  %v232_v6 = vld [vmem:[%s542_s2] sm:$0xff]  ;;  %vm267_vm0 = vcmask 1043456   ;;  %vm263_vm1 = vcmask 326656   ;;  %s548_s7 = smov (!%p220_p8, %s388_s7), 3 }
  0x1d   : > { %306 = vmatprep.mubr.bf16.mxu0 %v461_v5  ;;  %428 = vset.pattern.permute.xlu0 %v461_v5  ;;  %v231_v7 = vld [vmem:[%s197_s4 + $0x20] sm:$0xff]  ;;  %v431_v10 = vld [vmem:[%s197_s4 + $0x14] ss:$8 sps:$4 sm:$0xff]   ;;  %v433_v12 = vld [vmem:[%s197_s4 + $0x10] ss:$8 sps:$4 sm:$0xff]   ;;  %s389_s8 = sshll.u32 %s548_s7, 3 }
  0x1e   : > { %235 = vperm.xlu0 %428, %v232_v6   ;;  %v395_v8 = vcombine.high %v231_v7, %v231_v7  ;;  %v394_v9 = vcombine.low %v231_v7, %v231_v7  ;;  %v434_v13 = vld [vmem:[%s197_s4 + $0x4] ss:$8 sps:$4 sm:$0xff]   ;;  %v436_v14 = vld [vmem:[%s197_s4] ss:$8 sps:$4 sm:$0xff]   ;;  %s223_s11 = scalar_lea.vmem %s543_s3, %s389_s8 }
  0x1f   : > { %v226_v15 = vld [vmem:[%s541_s1] sm:$0xf] }
  0x20   : > { %396 = vmatprep.subr.msk.bf16.mxu0 %vm267_vm0, %v395_v8  ;;  %v269_v11 = vsel %vm267_vm0, %v394_v9, 0 }
  0x21   : > { %285 = vmatpush1.bf16.msra.mxu0 %v269_v11 }
  0x22   : > { %286 = vmatprep.subr.bf16.mxu0 %v431_v10 }
  0x25   : > { %287 = vmatpush1.bf16.msra.mxu0 %v433_v12 }
  0x26   : > { %288 = vmatprep.subr.bf16.mxu0 %v434_v13 }
  0x29   : > { %289 = vmatpush1.bf16.msra.mxu0 %v436_v14 }
  0x2c   : > { %397 = vmatmul.mubr.msk.bf16.vlgmr.msra.gmra.mxu0 %vm263_vm1, %v226_v15 }
  0x99   : > { %v236_v16 = vpop.permute.xlu0 %235 }
  0xec   : > { %v308_v17 = vpop.f32.mrf.mxu0 }
  0xed   : > { %v309_v18 = vadd.f32 %v308_v17, %v236_v16 }
  0xee   : > { %v310_v19 = vpop.f32.mrf.mxu0 }
  0xef   : > { %v315_v20 = vmax.f32 %v309_v18, 0.0  ;;  %v311_v21 = vadd.f32 %v310_v19, %v236_v16 }
  0xf0   : > { %v312_v22 = vpop.f32.mrf.mxu0 }
  0xf1   : > { %317 = vst [vmem:[%s223_s11] sm:$0xff] %v315_v20  ;;  %v316_v23 = vmax.f32 %v311_v21, 0.0 }
  0xf2   : > { %v313_v24 = vpop.f32.mrf.mxu0 }
  0xf3   : > { %318 = vst [vmem:[%s223_s11 + $0x8] sm:$0xff] %v316_v23 }
  0xf4 PF: > { %p10_p9 = scmp.ge.s32.totalorder %s499_s16, 4   ;;  %s544_s12 = smov %s455_s13 }
  0xf5   : > { %s545_s13 = smov %s508_s19  ;;  %s546_s14 = smov %s499_s16 }
  0xf6   :  { %12 = sbr.rel (!%p10_p9) target bundleno = 2 (0x2), region = 105 }

</bundles_post_ra>
